<compile_context>
chip_gen: v7x
topology: tpu7x:2x2x1
jax: 0.10.0
libtpu: 0.0.40
codegen_flags: <defaults>
</compile_context>

<pallas_src>
import functools

import numpy as np

import jax
import jax.numpy as jnp
from jax import lax
from jax.experimental import pallas as pl
from jax.experimental.pallas import tpu as pltpu

EPS = 1e-5


# --------------------------------------------------------------------------
# Kernel
# --------------------------------------------------------------------------
def _residual_block_kernel(x_ref,
                           m1_ref, b1_ref, m2_ref, b2_ref,
                           g1_ref, be1_ref, g2_ref, be2_ref,
                           bsum_ref, mup_ref, mdn_ref,
                           alpha_ref,
                           o_ref, *, inv_count):
    # x_ref     : (R, WC) f32     lane-dense input, R = N*H, WC = W*C
    # m*_ref    : (3, WC, WC) bf16 banded conv weights (one band per kernel row)
    # b*_ref    : (1, WC) f32     conv bias, tiled per lane
    # g*/be*    : (1, WC) f32     BN gamma / beta, tiled per lane
    # bsum_ref  : (WC, WC) bf16   0/1 channel-grouping matrix (pool + broadcast)
    # mup/mdn   : (R, 1)  f32     0/1 masks killing rows shifted across images
    # alpha_ref : (1, 1)  f32     PReLU scalar (SMEM)
    R = x_ref.shape[0]

    x = x_ref[...]                      # (R, WC) f32
    mask_up = mup_ref[...]              # 0 on the first row of each image
    mask_dn = mdn_ref[...]              # 0 on the last  row of each image
    bmat = bsum_ref[...]                # (WC, WC) bf16

    def shift_up(a):                    # row r <- a[r - 1]; boundary rows zeroed
        return jnp.concatenate([a[0:1, :], a[0:R - 1, :]], axis=0) * mask_up

    def shift_dn(a):                    # row r <- a[r + 1]; boundary rows zeroed
        return jnp.concatenate([a[1:R, :], a[R - 1:R, :]], axis=0) * mask_dn

    def conv3x3(a, m_ref, b_ref):
        # Banded-matmul conv: for each kernel row kh, the (W, C) -> (W, C)
        # convolution along W is one (R, WC) x (WC, WC) MXU matmul (bf16 in,
        # f32 accumulate).  "Same" padding along W is encoded in the band;
        # padding along H is the row masks above.
        acc = jnp.dot(shift_up(a).astype(jnp.bfloat16), m_ref[0],
                      preferred_element_type=jnp.float32)
        acc += jnp.dot(a.astype(jnp.bfloat16), m_ref[1],
                       preferred_element_type=jnp.float32)
        acc += jnp.dot(shift_dn(a).astype(jnp.bfloat16), m_ref[2],
                       preferred_element_type=jnp.float32)
        return acc + b_ref[...]

    def batchnorm(y, g_ref, be_ref):
        # Fused training-mode BN.  Row-reduce sum and sum-of-squares in f32 on
        # the XLU, then a single tiny (2, WC) x (WC, WC) 0/1 matmul pools over
        # the W groups inside the lane axis AND broadcasts the per-channel
        # result back to the lane-dense layout.  var = E[y^2] - mean^2, then
        # one fused y*scale + shift application.
        s_row = jnp.sum(y, axis=0, keepdims=True)             # (1, WC) f32
        ss_row = jnp.sum(y * y, axis=0, keepdims=True)        # (1, WC) f32
        stats = jnp.concatenate([s_row, ss_row], axis=0)      # (2, WC) f32
        pooled = jnp.dot(stats.astype(jnp.bfloat16), bmat,
                         preferred_element_type=jnp.float32)  # (2, WC) f32
        mean = pooled[0:1, :] * inv_count                     # (1, WC)
        ex2 = pooled[1:2, :] * inv_count                      # (1, WC)
        var = ex2 - mean * mean
        scale = g_ref[...] * lax.rsqrt(var + EPS)             # (1, WC)
        shift = be_ref[...] - mean * scale
        return y * scale + shift

    # conv1 -> bn1 -> prelu
    y = conv3x3(x, m1_ref, b1_ref)
    y = batchnorm(y, g1_ref, be1_ref)
    alpha = alpha_ref[0, 0]
    y = jnp.where(y > 0, y, alpha * y)

    # conv2 -> bn2
    z = conv3x3(y, m2_ref, b2_ref)
    z = batchnorm(z, g2_ref, be2_ref)

    # residual add (lane-dense, unmasked store)
    o_ref[...] = x + z


# --------------------------------------------------------------------------
# Host-side packing (once-per-model glue, not per-step compute)
# --------------------------------------------------------------------------
def _pack_banded_conv(w_hwio, W):
    """HWIO (3, 3, Cin, Cout) -> (3, W*Cin, W*Cout) banded bf16 matrices."""
    w = np.asarray(jax.device_get(w_hwio), dtype=np.float32)
    _, _, cin, cout = w.shape
    m = np.zeros((3, W * cin, W * cout), dtype=np.float32)
    for kh in range(3):
        for kw in range(3):
            for wo in range(W):
                wi = wo + kw - 1
                if 0 <= wi < W:                       # taps outside = zero pad
                    m[kh,
                      wi * cin:(wi + 1) * cin,
                      wo * cout:(wo + 1) * cout] = w[kh, kw]
    return jnp.asarray(m, dtype=jnp.bfloat16)


def _channel_sum_matrix(W, C):
    """(W*C, W*C) 0/1 matrix: lane l gets the sum over lanes of the same channel."""
    return jnp.asarray(np.tile(np.eye(C, dtype=np.float32), (W, W)),
                       dtype=jnp.bfloat16)


def residual_block(x_nchw, params):
    """PyTorch-style NCHW in / NCHW out; all compute happens in one kernel."""
    x = jnp.transpose(x_nchw, (0, 2, 3, 1)).astype(jnp.float32)   # NHWC
    N, H, W, C = x.shape
    R, WC = N * H, W * C
    x2 = x.reshape(R, WC)            # lane-dense view: lane index = w*C + c

    m1 = _pack_banded_conv(params["w1"], W)
    m2 = _pack_banded_conv(params["w2"], W)
    bsum = _channel_sum_matrix(W, C)

    tile_l = lambda p: jnp.tile(p.astype(jnp.float32), (1, W))    # (1,C)->(1,WC)
    b1l, b2l = tile_l(params["b1"]), tile_l(params["b2"])
    g1l, be1l = tile_l(params["g1"]), tile_l(params["be1"])
    g2l, be2l = tile_l(params["g2"]), tile_l(params["be2"])

    rows = np.arange(R)
    mask_up = jnp.asarray((rows % H != 0).astype(np.float32).reshape(R, 1))
    mask_dn = jnp.asarray((rows % H != H - 1).astype(np.float32).reshape(R, 1))

    vmem = pl.BlockSpec(memory_space=pltpu.MemorySpace.VMEM)
    smem = pl.BlockSpec(memory_space=pltpu.MemorySpace.SMEM)

    kernel = functools.partial(_residual_block_kernel,
                               inv_count=1.0 / float(N * H * W))

    # TODO(synk): for large N*H*W this should become a gridded two-phase design
    # (per-row-tile conv + BN-stats accumulation pass, then a normalize pass),
    # since BatchNorm needs full-batch statistics; at this test size the whole
    # problem is <1 MiB of VMEM so a grid would only add per-step overhead.
    out2 = pl.pallas_call(
        kernel,
        out_shape=jax.ShapeDtypeStruct((R, WC), jnp.float32),
        in_specs=[vmem] * 12 + [smem],
        out_specs=vmem,
    )(x2, m1, b1l, m2, b2l, g1l, be1l, g2l, be2l, bsum, mask_up, mask_dn,
      params["alpha"])

    return jnp.transpose(out2.reshape(N, H, W, C), (0, 3, 1, 2))   # NCHW


# --------------------------------------------------------------------------
# Pure-JAX reference (identical semantics) and parameter init
# --------------------------------------------------------------------------
def residual_block_reference(x_nchw, params):
    x = jnp.transpose(x_nchw, (0, 2, 3, 1)).astype(jnp.float32)

    def conv(y, w, b):
        out = lax.conv_general_dilated(
            y, w, window_strides=(1, 1), padding="SAME",
            dimension_numbers=("NHWC", "HWIO", "NHWC"),
            precision=lax.Precision.HIGHEST)
        return out + b.reshape(1, 1, 1, -1)

    def bn(y, g, be):
        m = jnp.mean(y, axis=(0, 1, 2), keepdims=True)
        v = jnp.mean((y - m) ** 2, axis=(0, 1, 2), keepdims=True)
        return (y - m) / jnp.sqrt(v + EPS) * g.reshape(1, 1, 1, -1) \
            + be.reshape(1, 1, 1, -1)

    r = conv(x, params["w1"], params["b1"])
    r = bn(r, params["g1"], params["be1"])
    a = params["alpha"][0, 0]
    r = jnp.where(r > 0, r, a * r)
    r = conv(r, params["w2"], params["b2"])
    r = bn(r, params["g2"], params["be2"])
    return jnp.transpose(x + r, (0, 3, 1, 2))


def init_params(key, channels):
    """Deterministic parameters matching the PyTorch module's shapes.

    Conv2d(C, C, 3, padding=1): weight stored HWIO (3, 3, C_in, C_out),
    bias (1, C).  BatchNorm2d(C): gamma/beta (1, C).  PReLU(): scalar (1, 1).
    """
    k1, k2, k3, k4, k5, k6, k7, k8 = jax.random.split(key, 8)
    C = channels
    return dict(
        w1=0.1 * jax.random.normal(k1, (3, 3, C, C), jnp.float32),
        b1=0.1 * jax.random.normal(k2, (1, C), jnp.float32),
        g1=1.0 + 0.1 * jax.random.normal(k3, (1, C), jnp.float32),
        be1=0.1 * jax.random.normal(k4, (1, C), jnp.float32),
        alpha=jnp.full((1, 1), 0.25, jnp.float32),
        w2=0.1 * jax.random.normal(k5, (3, 3, C, C), jnp.float32),
        b2=0.1 * jax.random.normal(k6, (1, C), jnp.float32),
        g2=1.0 + 0.1 * jax.random.normal(k7, (1, C), jnp.float32),
        be2=0.1 * jax.random.normal(k8, (1, C), jnp.float32),
    )


if __name__ == "__main__":
    N, C, H, W = 2, 8, 16, 16          # W*C = 128 -> fully lane-dense
    key = jax.random.PRNGKey(0)
    kx, kp = jax.random.split(key)
    x = jax.random.normal(kx, (N, C, H, W), jnp.float32)   # NCHW like PyTorch
    params = init_params(kp, C)

    out = jax.block_until_ready(residual_block(x, params))
    ref = jax.block_until_ready(residual_block_reference(x, params))

    assert out.shape == (N, C, H, W), out.shape
    # bf16 MXU feeds (f32 accumulate) vs the f32 HIGHEST reference: ~1e-3 rms
    # deviation after two conv+BN stages, so a 2e-2 tolerance is comfortable
    # while still catching any real (O(0.1+)) packing / masking / stats bug.
    assert jnp.allclose(out, ref, atol=2e-2, rtol=2e-2), \
        float(jnp.max(jnp.abs(out - ref)))

    print("KERNEL_OK")
</pallas_src>

<mosaic_0001>
module attributes {stable_mosaic.version = 11 : i64} {
  func.func @_residual_block_kernel(%arg0: memref<32x128xf32, #tpu.memory_space<vmem>>, %arg1: memref<3x128x128xbf16, #tpu.memory_space<vmem>>, %arg2: memref<1x128xf32, #tpu.memory_space<vmem>>, %arg3: memref<3x128x128xbf16, #tpu.memory_space<vmem>>, %arg4: memref<1x128xf32, #tpu.memory_space<vmem>>, %arg5: memref<1x128xf32, #tpu.memory_space<vmem>>, %arg6: memref<1x128xf32, #tpu.memory_space<vmem>>, %arg7: memref<1x128xf32, #tpu.memory_space<vmem>>, %arg8: memref<1x128xf32, #tpu.memory_space<vmem>>, %arg9: memref<128x128xbf16, #tpu.memory_space<vmem>>, %arg10: memref<32x1xf32, #tpu.memory_space<vmem>>, %arg11: memref<32x1xf32, #tpu.memory_space<vmem>>, %arg12: memref<1x1xf32, #tpu.memory_space<smem>>, %arg13: memref<32x128xf32, #tpu.memory_space<vmem>>) attributes {dimension_semantics = [], scalar_prefetch = 0 : i64, scratch_operands = 0 : i64, tpu.core_type = #tpu.core_type<tc>} {
    %c0 = arith.constant 0 : index
    %c0_0 = arith.constant 0 : index
    %0 = vector.load %arg0[%c0, %c0_0] : memref<32x128xf32, #tpu.memory_space<vmem>>, vector<32x128xf32>
    %c0_1 = arith.constant 0 : index
    %c0_2 = arith.constant 0 : index
    %1 = vector.load %arg10[%c0_1, %c0_2] : memref<32x1xf32, #tpu.memory_space<vmem>>, vector<32x1xf32>
    %c0_3 = arith.constant 0 : index
    %c0_4 = arith.constant 0 : index
    %2 = vector.load %arg11[%c0_3, %c0_4] : memref<32x1xf32, #tpu.memory_space<vmem>>, vector<32x1xf32>
    %c0_5 = arith.constant 0 : index
    %c0_6 = arith.constant 0 : index
    %3 = vector.load %arg9[%c0_5, %c0_6] : memref<128x128xbf16, #tpu.memory_space<vmem>>, vector<128x128xbf16>
    %4 = vector.extract_strided_slice %0 {offsets = [0, 0], sizes = [1, 128], strides = [1, 1]} : vector<32x128xf32> to vector<1x128xf32>
    %5 = vector.extract_strided_slice %0 {offsets = [0, 0], sizes = [31, 128], strides = [1, 1]} : vector<32x128xf32> to vector<31x128xf32>
    %6 = tpu.concatenate %4, %5 in 0 : vector<1x128xf32>, vector<31x128xf32> -> vector<32x128xf32>
    %7 = vector.broadcast %1 : vector<32x1xf32> to vector<32x128xf32>
    %8 = arith.mulf %6, %7 : vector<32x128xf32>
    %9 = arith.truncf %8 : vector<32x128xf32> to vector<32x128xbf16>
    %c0_7 = arith.constant 0 : index
    %c0_8 = arith.constant 0 : index
    %c0_9 = arith.constant 0 : index
    %10 = vector.load %arg1[%c0_7, %c0_8, %c0_9] : memref<3x128x128xbf16, #tpu.memory_space<vmem>>, vector<1x128x128xbf16>
    %11 = vector.shape_cast %10 : vector<1x128x128xbf16> to vector<128x128xbf16>
    %cst = arith.constant dense<0.000000e+00> : vector<32x128xf32>
    %12 = tpu.matmul %9, %11, %cst {dimension_numbers = #tpu.dot_dimension_numbers<[1], [0], [0], [1], [0, 0, 1, 1], [], []>} : vector<32x128xbf16>, vector<128x128xbf16>, vector<32x128xf32> -> vector<32x128xf32>
    %13 = arith.truncf %0 : vector<32x128xf32> to vector<32x128xbf16>
    %c1 = arith.constant 1 : index
    %c0_10 = arith.constant 0 : index
    %c0_11 = arith.constant 0 : index
    %14 = vector.load %arg1[%c1, %c0_10, %c0_11] : memref<3x128x128xbf16, #tpu.memory_space<vmem>>, vector<1x128x128xbf16>
    %15 = vector.shape_cast %14 : vector<1x128x128xbf16> to vector<128x128xbf16>
    %cst_12 = arith.constant dense<0.000000e+00> : vector<32x128xf32>
    %16 = tpu.matmul %13, %15, %cst_12 {dimension_numbers = #tpu.dot_dimension_numbers<[1], [0], [0], [1], [0, 0, 1, 1], [], []>} : vector<32x128xbf16>, vector<128x128xbf16>, vector<32x128xf32> -> vector<32x128xf32>
    %17 = arith.addf %12, %16 : vector<32x128xf32>
    %18 = vector.extract_strided_slice %0 {offsets = [1, 0], sizes = [31, 128], strides = [1, 1]} : vector<32x128xf32> to vector<31x128xf32>
    %19 = vector.extract_strided_slice %0 {offsets = [31, 0], sizes = [1, 128], strides = [1, 1]} : vector<32x128xf32> to vector<1x128xf32>
    %20 = tpu.concatenate %18, %19 in 0 : vector<31x128xf32>, vector<1x128xf32> -> vector<32x128xf32>
    %21 = vector.broadcast %2 : vector<32x1xf32> to vector<32x128xf32>
    %22 = arith.mulf %20, %21 : vector<32x128xf32>
    %23 = arith.truncf %22 : vector<32x128xf32> to vector<32x128xbf16>
    %c2 = arith.constant 2 : index
    %c0_13 = arith.constant 0 : index
    %c0_14 = arith.constant 0 : index
    %24 = vector.load %arg1[%c2, %c0_13, %c0_14] : memref<3x128x128xbf16, #tpu.memory_space<vmem>>, vector<1x128x128xbf16>
    %25 = vector.shape_cast %24 : vector<1x128x128xbf16> to vector<128x128xbf16>
    %cst_15 = arith.constant dense<0.000000e+00> : vector<32x128xf32>
    %26 = tpu.matmul %23, %25, %cst_15 {dimension_numbers = #tpu.dot_dimension_numbers<[1], [0], [0], [1], [0, 0, 1, 1], [], []>} : vector<32x128xbf16>, vector<128x128xbf16>, vector<32x128xf32> -> vector<32x128xf32>
    %27 = arith.addf %17, %26 : vector<32x128xf32>
    %c0_16 = arith.constant 0 : index
    %c0_17 = arith.constant 0 : index
    %28 = vector.load %arg2[%c0_16, %c0_17] : memref<1x128xf32, #tpu.memory_space<vmem>>, vector<1x128xf32>
    %29 = vector.broadcast %28 : vector<1x128xf32> to vector<32x128xf32>
    %30 = arith.addf %27, %29 : vector<32x128xf32>
    %cst_18 = arith.constant dense<0.000000e+00> : vector<128xf32>
    %31 = vector.multi_reduction <add>, %30, %cst_18 [0] : vector<32x128xf32> to vector<128xf32>
    %32 = vector.shape_cast %31 : vector<128xf32> to vector<1x128xf32>
    %33 = arith.mulf %30, %30 : vector<32x128xf32>
    %cst_19 = arith.constant dense<0.000000e+00> : vector<128xf32>
    %34 = vector.multi_reduction <add>, %33, %cst_19 [0] : vector<32x128xf32> to vector<128xf32>
    %35 = vector.shape_cast %34 : vector<128xf32> to vector<1x128xf32>
    %36 = tpu.concatenate %32, %35 in 0 : vector<1x128xf32>, vector<1x128xf32> -> vector<2x128xf32>
    %37 = arith.truncf %36 : vector<2x128xf32> to vector<2x128xbf16>
    %cst_20 = arith.constant dense<0.000000e+00> : vector<2x128xf32>
    %38 = tpu.matmul %37, %3, %cst_20 {dimension_numbers = #tpu.dot_dimension_numbers<[1], [0], [0], [1], [0, 0, 1, 1], [], []>} : vector<2x128xbf16>, vector<128x128xbf16>, vector<2x128xf32> -> vector<2x128xf32>
    %39 = vector.extract_strided_slice %38 {offsets = [0, 0], sizes = [1, 128], strides = [1, 1]} : vector<2x128xf32> to vector<1x128xf32>
    %cst_21 = arith.constant 0.001953125 : f32
    %40 = vector.broadcast %cst_21 : f32 to vector<1x128xf32>
    %41 = arith.mulf %39, %40 : vector<1x128xf32>
    %42 = vector.extract_strided_slice %38 {offsets = [1, 0], sizes = [1, 128], strides = [1, 1]} : vector<2x128xf32> to vector<1x128xf32>
    %cst_22 = arith.constant 0.001953125 : f32
    %43 = vector.broadcast %cst_22 : f32 to vector<1x128xf32>
    %44 = arith.mulf %42, %43 : vector<1x128xf32>
    %45 = arith.mulf %41, %41 : vector<1x128xf32>
    %46 = arith.subf %44, %45 : vector<1x128xf32>
    %c0_23 = arith.constant 0 : index
    %c0_24 = arith.constant 0 : index
    %47 = vector.load %arg5[%c0_23, %c0_24] : memref<1x128xf32, #tpu.memory_space<vmem>>, vector<1x128xf32>
    %cst_25 = arith.constant 9.99999974E-6 : f32
    %48 = vector.broadcast %cst_25 : f32 to vector<1x128xf32>
    %49 = arith.addf %46, %48 : vector<1x128xf32>
    %50 = math.rsqrt %49 : vector<1x128xf32>
    %51 = arith.mulf %47, %50 : vector<1x128xf32>
    %c0_26 = arith.constant 0 : index
    %c0_27 = arith.constant 0 : index
    %52 = vector.load %arg6[%c0_26, %c0_27] : memref<1x128xf32, #tpu.memory_space<vmem>>, vector<1x128xf32>
    %53 = arith.mulf %41, %51 : vector<1x128xf32>
    %54 = arith.subf %52, %53 : vector<1x128xf32>
    %55 = vector.broadcast %51 : vector<1x128xf32> to vector<32x128xf32>
    %56 = arith.mulf %30, %55 : vector<32x128xf32>
    %57 = vector.broadcast %54 : vector<1x128xf32> to vector<32x128xf32>
    %58 = arith.addf %56, %57 : vector<32x128xf32>
    %c0_28 = arith.constant 0 : index
    %c0_29 = arith.constant 0 : index
    %59 = memref.load %arg12[%c0_28, %c0_29] : memref<1x1xf32, #tpu.memory_space<smem>>
    %cst_30 = arith.constant 0.000000e+00 : f32
    %60 = vector.broadcast %cst_30 : f32 to vector<32x128xf32>
    %61 = arith.cmpf ogt, %58, %60 : vector<32x128xf32>
    %62 = vector.broadcast %59 : f32 to vector<32x128xf32>
    %63 = arith.mulf %62, %58 : vector<32x128xf32>
    %64 = arith.select %61, %58, %63 : vector<32x128xi1>, vector<32x128xf32>
    %65 = vector.extract_strided_slice %64 {offsets = [0, 0], sizes = [1, 128], strides = [1, 1]} : vector<32x128xf32> to vector<1x128xf32>
    %66 = vector.extract_strided_slice %64 {offsets = [0, 0], sizes = [31, 128], strides = [1, 1]} : vector<32x128xf32> to vector<31x128xf32>
    %67 = tpu.concatenate %65, %66 in 0 : vector<1x128xf32>, vector<31x128xf32> -> vector<32x128xf32>
    %68 = vector.broadcast %1 : vector<32x1xf32> to vector<32x128xf32>
    %69 = arith.mulf %67, %68 : vector<32x128xf32>
    %70 = arith.truncf %69 : vector<32x128xf32> to vector<32x128xbf16>
    %c0_31 = arith.constant 0 : index
    %c0_32 = arith.constant 0 : index
    %c0_33 = arith.constant 0 : index
    %71 = vector.load %arg3[%c0_31, %c0_32, %c0_33] : memref<3x128x128xbf16, #tpu.memory_space<vmem>>, vector<1x128x128xbf16>
    %72 = vector.shape_cast %71 : vector<1x128x128xbf16> to vector<128x128xbf16>
    %cst_34 = arith.constant dense<0.000000e+00> : vector<32x128xf32>
    %73 = tpu.matmul %70, %72, %cst_34 {dimension_numbers = #tpu.dot_dimension_numbers<[1], [0], [0], [1], [0, 0, 1, 1], [], []>} : vector<32x128xbf16>, vector<128x128xbf16>, vector<32x128xf32> -> vector<32x128xf32>
    %74 = arith.truncf %64 : vector<32x128xf32> to vector<32x128xbf16>
    %c1_35 = arith.constant 1 : index
    %c0_36 = arith.constant 0 : index
    %c0_37 = arith.constant 0 : index
    %75 = vector.load %arg3[%c1_35, %c0_36, %c0_37] : memref<3x128x128xbf16, #tpu.memory_space<vmem>>, vector<1x128x128xbf16>
    %76 = vector.shape_cast %75 : vector<1x128x128xbf16> to vector<128x128xbf16>
    %cst_38 = arith.constant dense<0.000000e+00> : vector<32x128xf32>
    %77 = tpu.matmul %74, %76, %cst_38 {dimension_numbers = #tpu.dot_dimension_numbers<[1], [0], [0], [1], [0, 0, 1, 1], [], []>} : vector<32x128xbf16>, vector<128x128xbf16>, vector<32x128xf32> -> vector<32x128xf32>
    %78 = arith.addf %73, %77 : vector<32x128xf32>
    %79 = vector.extract_strided_slice %64 {offsets = [1, 0], sizes = [31, 128], strides = [1, 1]} : vector<32x128xf32> to vector<31x128xf32>
    %80 = vector.extract_strided_slice %64 {offsets = [31, 0], sizes = [1, 128], strides = [1, 1]} : vector<32x128xf32> to vector<1x128xf32>
    %81 = tpu.concatenate %79, %80 in 0 : vector<31x128xf32>, vector<1x128xf32> -> vector<32x128xf32>
    %82 = vector.broadcast %2 : vector<32x1xf32> to vector<32x128xf32>
    %83 = arith.mulf %81, %82 : vector<32x128xf32>
    %84 = arith.truncf %83 : vector<32x128xf32> to vector<32x128xbf16>
    %c2_39 = arith.constant 2 : index
    %c0_40 = arith.constant 0 : index
    %c0_41 = arith.constant 0 : index
    %85 = vector.load %arg3[%c2_39, %c0_40, %c0_41] : memref<3x128x128xbf16, #tpu.memory_space<vmem>>, vector<1x128x128xbf16>
    %86 = vector.shape_cast %85 : vector<1x128x128xbf16> to vector<128x128xbf16>
    %cst_42 = arith.constant dense<0.000000e+00> : vector<32x128xf32>
    %87 = tpu.matmul %84, %86, %cst_42 {dimension_numbers = #tpu.dot_dimension_numbers<[1], [0], [0], [1], [0, 0, 1, 1], [], []>} : vector<32x128xbf16>, vector<128x128xbf16>, vector<32x128xf32> -> vector<32x128xf32>
    %88 = arith.addf %78, %87 : vector<32x128xf32>
    %c0_43 = arith.constant 0 : index
    %c0_44 = arith.constant 0 : index
    %89 = vector.load %arg4[%c0_43, %c0_44] : memref<1x128xf32, #tpu.memory_space<vmem>>, vector<1x128xf32>
    %90 = vector.broadcast %89 : vector<1x128xf32> to vector<32x128xf32>
    %91 = arith.addf %88, %90 : vector<32x128xf32>
    %cst_45 = arith.constant dense<0.000000e+00> : vector<128xf32>
    %92 = vector.multi_reduction <add>, %91, %cst_45 [0] : vector<32x128xf32> to vector<128xf32>
    %93 = vector.shape_cast %92 : vector<128xf32> to vector<1x128xf32>
    %94 = arith.mulf %91, %91 : vector<32x128xf32>
    %cst_46 = arith.constant dense<0.000000e+00> : vector<128xf32>
    %95 = vector.multi_reduction <add>, %94, %cst_46 [0] : vector<32x128xf32> to vector<128xf32>
    %96 = vector.shape_cast %95 : vector<128xf32> to vector<1x128xf32>
    %97 = tpu.concatenate %93, %96 in 0 : vector<1x128xf32>, vector<1x128xf32> -> vector<2x128xf32>
    %98 = arith.truncf %97 : vector<2x128xf32> to vector<2x128xbf16>
    %cst_47 = arith.constant dense<0.000000e+00> : vector<2x128xf32>
    %99 = tpu.matmul %98, %3, %cst_47 {dimension_numbers = #tpu.dot_dimension_numbers<[1], [0], [0], [1], [0, 0, 1, 1], [], []>} : vector<2x128xbf16>, vector<128x128xbf16>, vector<2x128xf32> -> vector<2x128xf32>
    %100 = vector.extract_strided_slice %99 {offsets = [0, 0], sizes = [1, 128], strides = [1, 1]} : vector<2x128xf32> to vector<1x128xf32>
    %cst_48 = arith.constant 0.001953125 : f32
    %101 = vector.broadcast %cst_48 : f32 to vector<1x128xf32>
    %102 = arith.mulf %100, %101 : vector<1x128xf32>
    %103 = vector.extract_strided_slice %99 {offsets = [1, 0], sizes = [1, 128], strides = [1, 1]} : vector<2x128xf32> to vector<1x128xf32>
    %cst_49 = arith.constant 0.001953125 : f32
    %104 = vector.broadcast %cst_49 : f32 to vector<1x128xf32>
    %105 = arith.mulf %103, %104 : vector<1x128xf32>
    %106 = arith.mulf %102, %102 : vector<1x128xf32>
    %107 = arith.subf %105, %106 : vector<1x128xf32>
    %c0_50 = arith.constant 0 : index
    %c0_51 = arith.constant 0 : index
    %108 = vector.load %arg7[%c0_50, %c0_51] : memref<1x128xf32, #tpu.memory_space<vmem>>, vector<1x128xf32>
    %cst_52 = arith.constant 9.99999974E-6 : f32
    %109 = vector.broadcast %cst_52 : f32 to vector<1x128xf32>
    %110 = arith.addf %107, %109 : vector<1x128xf32>
    %111 = math.rsqrt %110 : vector<1x128xf32>
    %112 = arith.mulf %108, %111 : vector<1x128xf32>
    %c0_53 = arith.constant 0 : index
    %c0_54 = arith.constant 0 : index
    %113 = vector.load %arg8[%c0_53, %c0_54] : memref<1x128xf32, #tpu.memory_space<vmem>>, vector<1x128xf32>
    %114 = arith.mulf %102, %112 : vector<1x128xf32>
    %115 = arith.subf %113, %114 : vector<1x128xf32>
    %116 = vector.broadcast %112 : vector<1x128xf32> to vector<32x128xf32>
    %117 = arith.mulf %91, %116 : vector<32x128xf32>
    %118 = vector.broadcast %115 : vector<1x128xf32> to vector<32x128xf32>
    %119 = arith.addf %117, %118 : vector<32x128xf32>
    %120 = arith.addf %0, %119 : vector<32x128xf32>
    %c0_55 = arith.constant 0 : index
    %c0_56 = arith.constant 0 : index
    %121 = vector.load %arg13[%c0_55, %c0_56] : memref<32x128xf32, #tpu.memory_space<vmem>>, vector<32x128xf32>
    tpu.vector_store %arg13[%c0_55, %c0_56], %120 {strides = array<i32>} : memref<32x128xf32, #tpu.memory_space<vmem>>, vector<32x128xf32>,
    return
  }
}

</mosaic_0001>

<bundles_post_ra>
// kernel: tpu_custom_call.1
= control target key start
LH: loop header
LB: loop body
LE: loop exit
PB: predicated region body
PF: predicated region fallthrough
CT: control target
= control target key end

     0   :  { %19 = vsyncpa [#allocation4], 0  ;;  %s2063_s0 = inlined_call_operand.vmem [shape: f32[32,128], index: 0, kind: input, shape index: {}]   ;;  %s2064_s1 = inlined_call_operand.hbm [shape: bf16[3,128,128], index: 1, kind: input, shape index: {}]   ;;  %s2065_s2 = inlined_call_operand.vmem [shape: f32[1,128], index: 2, kind: input, shape index: {}]   ;;  %s2066_s3 = inlined_call_operand.hbm [shape: bf16[3,128,128], index: 3, kind: input, shape index: {}]   ;;  %s2067_s4 = inlined_call_operand.vmem [shape: f32[1,128], index: 4, kind: input, shape index: {}]   ;;  %s2068_s5 = inlined_call_operand.vmem [shape: f32[1,128], index: 5, kind: input, shape index: {}]   ;;  %s2069_s6 = inlined_call_operand.vmem [shape: f32[1,128], index: 6, kind: input, shape index: {}]   ;;  %s2070_s7 = inlined_call_operand.vmem [shape: f32[1,128], index: 7, kind: input, shape index: {}]   ;;  %s2071_s8 = inlined_call_operand.vmem [shape: f32[1,128], index: 8, kind: input, shape index: {}]   ;;  %s2072_s9 = inlined_call_operand.vmem [shape: bf16[128,128], index: 9, kind: input, shape index: {}]   ;;  %s2073_s10 = inlined_call_operand.vmem [shape: f32[32,1], index: 10, kind: input, shape index: {}]   ;;  %s2074_s11 = inlined_call_operand.vmem [shape: f32[32,1], index: 11, kind: input, shape index: {}]   ;;  %s2075_s12 = inlined_call_operand.<no memory space> [shape: f32[1,1], index: 12, kind: input, shape index: {}]   ;;  %s2076_s13 = inlined_call_operand.hbm [shape: f32[32,128], index: 13, kind: output, shape index: {}]  }
   0x1   :  { %20 = vsyncpa [#allocation7], 0 }
   0x2   :  { %21 = vsyncpa [#allocation5], 0  ;;  %s1716_s25 = smov [#allocation3]   ;;  %s1644_s29 = scalar_lea.hbm %s2064_s1, 3072 }
   0x3   :  { %s29_s26 = sshll.u32 %s1716_s25, 4  ;;  %p1645_p0 = scmp.ne.s32.totalorder %s2064_s1, %s1644_s29  ;;  %s30_s26 = int_to_ptr.vmem [resolvable:$true] %s29_s26 }
   0x4   :  { %p1648_p1 = scmp.lt.u32.totalorder %s1644_s29, %s2064_s1 }
   0x6   :  { %p1650_p2 = pnand %p1648_p1, %p1645_p0 }
   0x8   :  { %1653 = shalt.err (!%p1650_p2)
}
   0x9   :  { %s1654_s17 = scalar_lea.vmem %s30_s26, 3072  ;;  %p1659_p4 = scmp.lt.s32.totalorder %s30_s26, %s30_s26 }
   0xa   :  { %p1655_p3 = scmp.ne.s32.totalorder %s30_s26, %s1654_s17  ;;  %p1660_p5 = scmp.lt.s32.totalorder %s1654_s17, %s1654_s17 }
   0xc   :  { %p1661_p6 = por %p1660_p5, %p1659_p4 }
   0xe   :  { %p1662_p7 = pnand %p1661_p6, %p1655_p3 }
  0x10   :  { %1665 = shalt.err (!%p1662_p7)
}
  0x11   :  { %s1717_s18 = smov 64   ;;  %s1718_s19 = smov 4  }
  0x12   :  { %35 = dma.hbm_to_vmem [thread:$0]  %s2064_s1, 3072, %s30_s26, [#allocation4], %s1717_s18, %s1717_s18, %s1718_s19  }
  0x13   :  { %s1719_s22 = smov [#allocation6]   ;;  %s1666_s27 = scalar_lea.hbm %s2066_s3, 3072 }
  0x14   :  { %s43_s23 = sshll.u32 %s1719_s22, 4  ;;  %p1667_p8 = scmp.ne.s32.totalorder %s2066_s3, %s1666_s27  ;;  %s44_s23 = int_to_ptr.vmem [resolvable:$true] %s43_s23 }
  0x15   :  { %p1670_p9 = scmp.lt.u32.totalorder %s1666_s27, %s2066_s3 }
  0x17   :  { %p1672_p10 = pnand %p1670_p9, %p1667_p8 }
  0x19   :  { %1675 = shalt.err (!%p1672_p10)
}
  0x1a   :  { %s1676_s15 = scalar_lea.vmem %s44_s23, 3072  ;;  %p1681_p12 = scmp.lt.s32.totalorder %s44_s23, %s44_s23 }
  0x1b   :  { %p1677_p11 = scmp.ne.s32.totalorder %s44_s23, %s1676_s15  ;;  %p1682_p13 = scmp.lt.s32.totalorder %s1676_s15, %s1676_s15 }
  0x1d   :  { %p1683_p0 = por %p1682_p13, %p1681_p12 }
  0x1f   :  { %p1684_p1 = pnand %p1683_p0, %p1677_p11 }
  0x21   :  { %1687 = shalt.err (!%p1684_p1)
}
  0x22   :  { %49 = dma.hbm_to_vmem [thread:$0]  %s2066_s3, 3072, %s44_s23, [#allocation7], %s1717_s18, %s1717_s18, %s1718_s19  }
  0x23   :  { %1710 = dma.done.wait [#allocation4], 3072  }
  0x24   :  { %1711 = vsyncadd [#allocation4], 4294964224 }
  0x25   :  { %1712 = dma.done.wait [#allocation7], 3072  }
  0x26   :  { %1713 = vsyncadd [#allocation7], 4294964224  ;;  %v1720_v0 = vmov 0   ;;  %v81_v1 = vld [vmem:[%s2073_s10 + $0x10] sm:$0xff]  ;;  %v79_v2 = vld [vmem:[%s2073_s10] sm:$0xff]  ;;  %v1721_v28 = vmov 0.0  }
  0x27   :  { %1581 = vset.pattern.permute.xlu1 %v1720_v0  ;;  %1580 = vset.pattern.permute.xlu0 %v1720_v0  ;;  %v82_v3 = vld [vmem:[%s2073_s10 + $0x18] sm:$0xff]  ;;  %v80_v4 = vld [vmem:[%s2073_s10 + $0x8] sm:$0xff]  ;;  %v1582_v5 = vld [vmem:[#allocation3 + $0x40] sm:$0xff]   ;;  %vm107_vm0 = vcmask 1040384   ;;  %vm375_vm1 = vcmask 1046528   ;;  %vm1722_vm2 = vmmov 0  }
  0x28   :  { %132 = vperm.xlu1 %1581, %v81_v1   ;;  %122 = vperm.xlu0 %1580, %v79_v2   ;;  %v1583_v6 = vld [vmem:[#allocation3 + $0x48] sm:$0xff]   ;;  %v83_v8 = vld [vmem:[%s2074_s11] sm:$0xff]  ;;  %v1584_v9 = vld [vmem:[#allocation3 + $0x50] sm:$0xff]   ;;  %s1724_s3 = smov [#allocation8]  }
  0x29   :  { %v84_v7 = vld [vmem:[%s2074_s11 + $0x8] sm:$0xff]  ;;  %1393 = vmatprep.subr.bf16.mxu0 %v1582_v5  ;;  %v86_v10 = vld [vmem:[%s2074_s11 + $0x18] sm:$0xff]  ;;  %v85_v11 = vld [vmem:[%s2074_s11 + $0x10] sm:$0xff]  ;;  %1453 = vmatprep.subr.bf16.mxu1 %v1721_v28  ;;  %s1244_s18 = sshll.u32 %s1724_s3, 4  ;;  %s1245_s18 = int_to_ptr.vmem [resolvable:$true] %s1244_s18 }
  0x2a   :  { %1394 = vmatpush3.bf16.msra.mxu0 %v1582_v5  ;;  %v1848_v12 = vld [vmem:[%s2063_s0] sm:$0xff]  ;;  %v1853_v13 = vld [vmem:[%s2063_s0 + $0x8] sm:$0xff]  ;;  %v1585_v14 = vld [vmem:[#allocation3 + $0x58] sm:$0xff]   ;;  %1469 = vmatprep.mubr.msk.bf16.mxu1 %vm1722_vm2, %v1721_v28  ;;  %s1688_s25 = scalar_lea.vmem %s1245_s18, 512  ;;  %p1693_p3 = scmp.lt.s32.totalorder %s1245_s18, %s1245_s18 }
  0x2b   :  { %1395 = vmatprep.subr.bf16.mxu0 %v1583_v6  ;;  %v162_v15 = vpack.c.bf16 %v1853_v13, %v1848_v12  ;;  %v1586_v16 = vld [vmem:[#allocation3 + $0x60] sm:$0xff]   ;;  %v1587_v17 = vld [vmem:[#allocation3 + $0x68] sm:$0xff]   ;;  %v1588_v18 = vld [vmem:[#allocation3 + $0x70] sm:$0xff]   ;;  %v108_v34 = vrot.slane %v1848_v12, 7  ;;  %v109_v35 = vrot.slane %v1853_v13, 7  ;;  %v377_v41 = vrot.slane %v1853_v13, 1  ;;  %p1689_p2 = scmp.ne.s32.totalorder %s1245_s18, %s1688_s25  ;;  %p1694_p4 = scmp.lt.s32.totalorder %s1688_s25, %s1688_s25 }
  0x2c   :  { %137 = vperm.xlu1 %1581, %v82_v3   ;;  %127 = vperm.xlu0 %1580, %v80_v4   ;;  %v1589_v19 = vld [vmem:[#allocation3 + $0x78] sm:$0xff]   ;;  %v1860_v20 = vld [vmem:[%s2063_s0 + $0x10] sm:$0xff]  ;;  %v1590_v21 = vld [vmem:[#allocation3] sm:$0xff]   ;;  %v376_v42 = vrot.slane %v1848_v12, 1 }
  0x2d   :  { %1409 = vmatprep.mubr.bf16.mxu0 %v162_v15  ;;  %v1865_v22 = vld [vmem:[%s2063_s0 + $0x18] sm:$0xff]  ;;  %v1591_v24 = vld [vmem:[#allocation3 + $0x8] sm:$0xff]   ;;  %v1592_v25 = vld [vmem:[#allocation3 + $0x10] sm:$0xff]   ;;  %v111_v36 = vrot.slane %v1860_v20, 7  ;;  %v119_v40 = vsel %vm107_vm0, %v1848_v12, %v108_v34  ;;  %v110_v45 = vsel %vm107_vm0, %v108_v34, %v109_v35  ;;  %v379_v46 = vrot.slane %v1860_v20, 1  ;;  %p1695_p5 = por %p1694_p4, %p1693_p3 }
  0x2e   :  { %1396 = vmatpush3.bf16.msra.mxu0 %v1583_v6  ;;  %v163_v23 = vpack.c.bf16 %v1865_v22, %v1860_v20  ;;  %v1593_v26 = vld [vmem:[#allocation3 + $0x18] sm:$0xff]   ;;  %v1872_v27 = vld [vmem:[%s2072_s9] sm:$0xff]   ;;  %v1595_v30 = vld [vmem:[#allocation3 + $0x28] sm:$0xff]   ;;  %v113_v37 = vrot.slane %v1865_v22, 7  ;;  %v378_v54 = vsel %vm375_vm1, %v376_v42, %v377_v41  ;;  %v381_v4 = vrot.slane %v1865_v22, 1 }
  0x2f   :  { %1397 = vmatprep.subr.bf16.mxu0 %v1584_v9  ;;  %1454 = vmatpush3.bf16.msra.mxu1 %v1872_v27  ;;  %v1594_v29 = vld [vmem:[#allocation3 + $0x20] sm:$0xff]   ;;  %v1596_v31 = vld [vmem:[#allocation3 + $0x30] sm:$0xff]   ;;  %v1597_v32 = vld [vmem:[#allocation3 + $0x38] sm:$0xff]   ;;  %v112_v43 = vsel %vm107_vm0, %v109_v35, %v111_v36  ;;  %v380_v53 = vsel %vm375_vm1, %v377_v41, %v379_v46  ;;  %p1696_p6 = pnand %p1695_p5, %p1689_p2 }
  0x30   :  { %395 = vperm.xlu1 %1581, %v84_v7   ;;  %390 = vperm.xlu0 %1580, %v83_v8   ;;  %v1598_v33 = vld [vmem:[#allocation3 + $0x80] sm:$0xff]   ;;  %v114_v44 = vsel %vm107_vm0, %v111_v36, %v113_v37  ;;  %v1599_v59 = vld [vmem:[#allocation3 + $0x88] sm:$0xff]   ;;  %v1600_v63 = vld [vmem:[#allocation3 + $0x90] sm:$0xff]   ;;  %v387_v7 = vsel %vm375_vm1, %v381_v4, %v1865_v22 }
  0x31   :  { %1455 = vmatprep.subr.bf16.mxu1 %v1721_v28  ;;  %v1601_v0 = vld [vmem:[#allocation3 + $0x98] sm:$0xff]   ;;  %v1602_v1 = vld [vmem:[#allocation3 + $0xa0] sm:$0xff]   ;;  %v1603_v2 = vld [vmem:[#allocation3 + $0xa8] sm:$0xff]  }
  0x32   :  { %1398 = vmatpush3.bf16.msra.mxu0 %v1584_v9  ;;  %v1604_v3 = vld [vmem:[#allocation3 + $0xb0] sm:$0xff]   ;;  %v1605_v5 = vld [vmem:[#allocation3 + $0xb8] sm:$0xff]   ;;  %v382_v9 = vsel %vm375_vm1, %v379_v46, %v381_v4  ;;  %v1607_v13 = vld [vmem:[%s2072_s9 + $0x8] sm:$0xff]  }
  0x33   :  { %1399 = vmatprep.subr.bf16.mxu0 %v1585_v14  ;;  %1456 = vmatpush3.bf16.msra.mxu1 %v1607_v13  ;;  %v1609_v15 = vld [vmem:[%s2072_s9 + $0x18] sm:$0xff]  }
  0x34   :  { %405 = vperm.xlu1 %1581, %v86_v10   ;;  %400 = vperm.xlu0 %1580, %v85_v11   ;;  %v1621_v4 = vld [vmem:[#allocation6 + $0x78] sm:$0xff]  }
  0x35   :  { %1457 = vmatprep.subr.bf16.mxu1 %v1721_v28 }
  0x36   :  { %1400 = vmatpush3.bf16.msra.mxu0 %v1585_v14  ;;  %v1608_v14 = vld [vmem:[%s2072_s9 + $0x10] sm:$0xff]  }
  0x37   :  { %1401 = vmatprep.subr.bf16.mxu0 %v1586_v16  ;;  %1458 = vmatpush3.bf16.msra.mxu1 %v1608_v14 }
  0x38   :  { %1459 = vmatprep.subr.bf16.mxu1 %v1721_v28 }
  0x3a   :  { %1402 = vmatpush3.bf16.msra.mxu0 %v1586_v16  ;;  %v1610_v16 = vld [vmem:[%s2072_s9 + $0x20] sm:$0xff]  }
  0x3b   :  { %1403 = vmatprep.subr.bf16.mxu0 %v1587_v17  ;;  %1460 = vmatpush3.bf16.msra.mxu1 %v1609_v15 }
  0x3c   :  { %1461 = vmatprep.subr.bf16.mxu1 %v1721_v28 }
  0x3e   :  { %1404 = vmatpush3.bf16.msra.mxu0 %v1587_v17  ;;  %v1611_v17 = vld [vmem:[%s2072_s9 + $0x28] sm:$0xff]  }
  0x3f   :  { %1405 = vmatprep.subr.bf16.mxu0 %v1588_v18  ;;  %1462 = vmatpush3.bf16.msra.mxu1 %v1610_v16 }
  0x40   :  { %1463 = vmatprep.subr.bf16.mxu1 %v1721_v28 }
  0x42   :  { %1406 = vmatpush3.bf16.msra.mxu0 %v1588_v18  ;;  %v1612_v18 = vld [vmem:[%s2072_s9 + $0x30] sm:$0xff]  }
  0x43   :  { %1407 = vmatprep.subr.bf16.mxu0 %v1589_v19  ;;  %1464 = vmatpush3.bf16.msra.mxu1 %v1611_v17 }
  0x44   :  { %1465 = vmatprep.subr.bf16.mxu1 %v1721_v28 }
  0x46   :  { %1408 = vmatpush3.bf16.msra.mxu0 %v1589_v19  ;;  %v1613_v19 = vld [vmem:[%s2072_s9 + $0x38] sm:$0xff]  }
  0x47   :  { %1413 = vmatprep.subr.bf16.mxu0 %v1590_v21  ;;  %1466 = vmatpush3.bf16.msra.mxu1 %v1612_v18 }
  0x48   :  { %1467 = vmatprep.subr.bf16.mxu1 %v1721_v28 }
  0x49   :  { %1410 = vmatmul.mubr.bf16.vlgmr.msra.gmra.mrb[0].mxu0 %v163_v23 }
  0x4a   :  { %1414 = vmatpush3.bf16.msra.mxu0 %v1590_v21  ;;  %v1281_v21 = vld [vmem:[%s2065_s2] ss:$0 sm:$0xff] }
  0x4b   :  { %1415 = vmatprep.subr.bf16.mxu0 %v1591_v24  ;;  %1468 = vmatpush3.bf16.msra.mxu1 %v1613_v19 }
  0x4e   :  { %1416 = vmatpush3.bf16.msra.mxu0 %v1591_v24 }
  0x4f   :  { %1417 = vmatprep.subr.bf16.mxu0 %v1592_v25 }
  0x52   :  { %1418 = vmatpush3.bf16.msra.mxu0 %v1592_v25 }
  0x53   :  { %1419 = vmatprep.subr.bf16.mxu0 %v1593_v26 }
  0x56   :  { %1420 = vmatpush3.bf16.msra.mxu0 %v1593_v26 }
  0x57   :  { %1421 = vmatprep.subr.bf16.mxu0 %v1594_v29 }
  0x5a   :  { %1422 = vmatpush3.bf16.msra.mxu0 %v1594_v29 }
  0x5b   :  { %1423 = vmatprep.subr.bf16.mxu0 %v1595_v30 }
  0x5e   :  { %1424 = vmatpush3.bf16.msra.mxu0 %v1595_v30 }
  0x5f   :  { %1425 = vmatprep.subr.bf16.mxu0 %v1596_v31 }
  0x62   :  { %1426 = vmatpush3.bf16.msra.mxu0 %v1596_v31 }
  0x63   :  { %1427 = vmatprep.subr.bf16.mxu0 %v1597_v32 }
  0x66   :  { %1428 = vmatpush3.bf16.msra.mxu0 %v1597_v32 }
  0x67   :  { %1433 = vmatprep.subr.bf16.mxu0 %v1598_v33 }
  0xa7   :  { %v1881_v38 = vpop.permute.xlu1 %132  ;;  %v1883_v39 = vpop.permute.xlu0 %122 }
  0xa8   :  { %v142_v49 = vmul.f32 %v1881_v38, %v112_v43  ;;  %v140_v50 = vmul.f32 %v1883_v39, %v119_v40 }
  0xab   :  { %v1893_v47 = vpop.permute.xlu1 %137  ;;  %v1895_v48 = vpop.permute.xlu0 %127 }
  0xac   :  { %v143_v51 = vmul.f32 %v1893_v47, %v114_v44  ;;  %v141_v52 = vmul.f32 %v1895_v48, %v110_v45 }
  0xae   :  { %v145_v55 = vpack.c.bf16 %v143_v51, %v142_v49  ;;  %v144_v56 = vpack.c.bf16 %v141_v52, %v140_v50 }
  0xaf   :  { %v1903_v57 = vpop.permute.xlu1 %395  ;;  %v1905_v58 = vpop.permute.xlu0 %390 }
  0xb0   :  { %v409_v60 = vmul.f32 %v1903_v57, %v380_v53  ;;  %v408_v61 = vmul.f32 %v1905_v58, %v378_v54  ;;  %1429 = vmatprep.mubr.bf16.mxu0 %v144_v56 }
  0xb1   :  { %1430 = vmatmul.mubr.bf16.vlgmr.msra.gmra.mrb[0].mxu0 %v145_v55 }
  0xb2   :  { %v412_v62 = vpack.c.bf16 %v409_v60, %v408_v61  ;;  %1434 = vmatpush3.bf16.msra.mxu0 %v1598_v33  ;;  %v1614_v61 = vld [vmem:[#allocation6 + $0x40] sm:$0xff]  }
  0xb3   :  { %1435 = vmatprep.subr.bf16.mxu0 %v1599_v59  ;;  %v1910_v6 = vpop.permute.xlu1 %405  ;;  %v1914_v8 = vpop.permute.xlu0 %400  ;;  %1473 = vmatprep.subr.bf16.mxu1 %v1614_v61 }
  0xb4   :  { %1449 = vmatprep.mubr.bf16.mxu0 %v412_v62  ;;  %v411_v10 = vmul.f32 %v1910_v6, %v387_v7  ;;  %v410_v11 = vmul.f32 %v1914_v8, %v382_v9  ;;  %v1615_v62 = vld [vmem:[#allocation6 + $0x48] sm:$0xff]  }
  0xb6   :  { %1436 = vmatpush3.bf16.msra.mxu0 %v1599_v59  ;;  %v413_v12 = vpack.c.bf16 %v411_v10, %v410_v11 }
  0xb7   :  { %1437 = vmatprep.subr.bf16.mxu0 %v1600_v63 }
  0xba   :  { %1438 = vmatpush3.bf16.msra.mxu0 %v1600_v63  ;;  %v1616_v63 = vld [vmem:[#allocation6 + $0x50] sm:$0xff]  }
  0xbb   :  { %1439 = vmatprep.subr.bf16.mxu0 %v1601_v0 }
  0xbe   :  { %1440 = vmatpush3.bf16.msra.mxu0 %v1601_v0  ;;  %v1617_v0 = vld [vmem:[#allocation6 + $0x58] sm:$0xff]  }
  0xbf   :  { %1441 = vmatprep.subr.bf16.mxu0 %v1602_v1 }
  0xc2   :  { %1442 = vmatpush3.bf16.msra.mxu0 %v1602_v1  ;;  %v1618_v1 = vld [vmem:[#allocation6 + $0x60] sm:$0xff]  }
  0xc3   :  { %1443 = vmatprep.subr.bf16.mxu0 %v1603_v2 }
  0xc6   :  { %1444 = vmatpush3.bf16.msra.mxu0 %v1603_v2  ;;  %v1619_v2 = vld [vmem:[#allocation6 + $0x68] sm:$0xff]  }
  0xc7   :  { %1445 = vmatprep.subr.bf16.mxu0 %v1604_v3 }
  0xca   :  { %1446 = vmatpush3.bf16.msra.mxu0 %v1604_v3  ;;  %v1620_v3 = vld [vmem:[#allocation6 + $0x70] sm:$0xff]  }
  0xcb   :  { %1447 = vmatprep.subr.bf16.mxu0 %v1605_v5 }
  0xce   :  { %1448 = vmatpush3.bf16.msra.mxu0 %v1605_v5  ;;  %v1622_v5 = vld [vmem:[#allocation6] sm:$0xff]  }
  0xcf   :  { %1533 = vmatprep.subr.bf16.mxu0 %v1721_v28 }
  0xd1   :  { %1450 = vmatmul.mubr.bf16.vlgmr.msra.gmra.mrb[0].mxu0 %v413_v12 }
  0xd2   :  { %1534 = vmatpush3.bf16.msra.mxu0 %v1872_v27  ;;  %1549 = vmatprep.mubr.msk.bf16.mxu0 %vm1722_vm2, %v1721_v28 }
  0xd3   :  { %1535 = vmatprep.subr.bf16.mxu0 %v1721_v28 }
  0xd6   :  { %1536 = vmatpush3.bf16.msra.mxu0 %v1607_v13 }
  0xd7   :  { %1537 = vmatprep.subr.bf16.mxu0 %v1721_v28 }
  0xda   :  { %1538 = vmatpush3.bf16.msra.mxu0 %v1608_v14 }
  0xdb   :  { %1539 = vmatprep.subr.bf16.mxu0 %v1721_v28 }
  0xde   :  { %1540 = vmatpush3.bf16.msra.mxu0 %v1609_v15 }
  0xdf   :  { %1541 = vmatprep.subr.bf16.mxu0 %v1721_v28 }
  0xe2   :  { %1542 = vmatpush3.bf16.msra.mxu0 %v1610_v16 }
  0xe3   :  { %1543 = vmatprep.subr.bf16.mxu0 %v1721_v28 }
  0xe6   :  { %1544 = vmatpush3.bf16.msra.mxu0 %v1611_v17  ;;  %v1723_v17 = vmov 1966171168  }
  0xe7   :  { %1545 = vmatprep.subr.bf16.mxu0 %v1721_v28 }
  0xea   :  { %1546 = vmatpush3.bf16.msra.mxu0 %v1612_v18  ;;  %v666_v18 = vunpack.c.l.s4 %v1723_v17 }
  0xeb   :  { %1547 = vmatprep.subr.bf16.mxu0 %v1721_v28 }
  0xee   :  { %1548 = vmatpush3.bf16.msra.mxu0 %v1613_v19  ;;  %v668_v19 = vlaneseq }
 0x1a4   :  { %v1451_v23 = vpop.f32.mrb[0].mxu0 }
 0x1a5   :  { %v513_v24 = vpop.f32.mrb[1].mxu0  ;;  %v1962_v29 = vadd.f32 %v1451_v23, %v1281_v21  ;;  %v669_v23 = vshrl.u32 %v668_v19, 7 }
 0x1a6   :  { %v1960_v25 = vadd.f32 %v1281_v21, %v513_v24  ;;  %v1452_v26 = vpop.f32.mrb[2].mxu0 }
 0x1a7   :  { %v516_v27 = vpop.f32.mrb[3].mxu0  ;;  %v1968_v28 = vadd.f32 %v1452_v26, %v1281_v21  ;;  %v554_v34 = vmul.f32 %v1962_v29, %v1962_v29 }
 0x1a8   :  { %v1964_v30 = vadd.f32 %v1281_v21, %v516_v27  ;;  %v552_v31 = vmul.f32 %v1960_v25, %v1960_v25  ;;  %v667_v21 = vunpack.c.0.s8 %v666_v18 }
 0x1a9   :  { %v555_v37 = vmul.f32 %v1968_v28, %v1968_v28 }
 0x1aa   :  { %v543_v32 = vadd.f32 %v1964_v30, %v1960_v25  ;;  %v553_v33 = vmul.f32 %v1964_v30, %v1964_v30  ;;  %v1981_v24 = vsub.s32 %v667_v21, %v669_v23 }
 0x1ac   :  { %v544_v35 = vadd.f32 %v543_v32, %v1962_v29  ;;  %v556_v36 = vadd.f32 %v553_v33, %v552_v31  ;;  %v661_v32 = vld [vmem:[%s2068_s5] sm:$0x1] }
 0x1ae   :  { %v545_v40 = vadd.f32 %v544_v35, %v1968_v28  ;;  %v557_v41 = vadd.f32 %v556_v36, %v554_v34  ;;  %v1988_v34 = vsub.s32 0, %v669_v23  ;;  %v682_v36 = vld [vmem:[%s2069_s6] sm:$0x1] }
 0x1b0   :  { %v546_v42 = vrot.slane %v545_v40, 4  ;;  %v558_v43 = vadd.f32 %v557_v41, %v555_v37 }
 0x1b2   :  { %v547_v44 = vadd.f32 %v546_v42, %v545_v40  ;;  %v559_v45 = vrot.slane %v558_v43, 4 }
 0x1b4   :  { %v548_v46 = vrot.slane %v547_v44, 2  ;;  %v560_v49 = vadd.f32 %v559_v45, %v558_v43 }
 0x1b6   :  { %v549_v50 = vadd.f32 %v548_v46, %v547_v44  ;;  %v561_v51 = vrot.slane %v560_v49, 2 }
 0x1b8   :  { %v550_v52 = vrot.slane %v549_v50, 1  ;;  %v562_v53 = vadd.f32 %v561_v51, %v560_v49  ;;  %v710_v49 = vstv %s2075_s12 }
 0x1ba   :  { %v563_v54 = vrot.slane %v562_v53, 1  ;;  %v551_v55 = vadd.f32 %v550_v52, %v549_v50 }
 0x1bc   :  { %v564_v56 = vadd.f32 %v563_v54, %v562_v53 }
 0x1be   :  { %v565_v59 = vsel %vm107_vm0, %v551_v55, %v564_v56 }
 0x1bf   :  { %v566_v60 = vpack.c.bf16 %v565_v59, %v565_v59 }
 0x1c1   :  { %1470 = vmatmul.mubr.bf16.vlgmr.msra.gmra.mrb[0].mxu1 %v566_v60 }
 0x1c2   :  { %1474 = vmatpush3.bf16.msra.mxu1 %v1614_v61 }
 0x1c3   :  { %1475 = vmatprep.subr.bf16.mxu1 %v1615_v62 }
 0x1c6   :  { %1476 = vmatpush3.bf16.msra.mxu1 %v1615_v62 }
 0x1c7   :  { %1477 = vmatprep.subr.bf16.mxu1 %v1616_v63 }
 0x1ca   :  { %1478 = vmatpush3.bf16.msra.mxu1 %v1616_v63 }
 0x1cb   :  { %1479 = vmatprep.subr.bf16.mxu1 %v1617_v0 }
 0x1ce   :  { %1480 = vmatpush3.bf16.msra.mxu1 %v1617_v0  ;;  %v1623_v0 = vld [vmem:[#allocation6 + $0x8] sm:$0xff]  }
 0x1cf   :  { %1481 = vmatprep.subr.bf16.mxu1 %v1618_v1 }
 0x1d2   :  { %1482 = vmatpush3.bf16.msra.mxu1 %v1618_v1 }
 0x1d3   :  { %1483 = vmatprep.subr.bf16.mxu1 %v1619_v2 }
 0x1d6   :  { %1484 = vmatpush3.bf16.msra.mxu1 %v1619_v2 }
 0x1d7   :  { %1485 = vmatprep.subr.bf16.mxu1 %v1620_v3 }
 0x1da   :  { %1486 = vmatpush3.bf16.msra.mxu1 %v1620_v3 }
 0x1db   :  { %1487 = vmatprep.subr.bf16.mxu1 %v1621_v4 }
 0x1de   :  { %1488 = vmatpush3.bf16.msra.mxu1 %v1621_v4 }
 0x1df   :  { %1493 = vmatprep.subr.bf16.mxu1 %v1622_v5 }
 0x294   :  { %v649_v7 = vpop.f32.mrb[0].mxu1 }
 0x295   :  { %v655_v9 = vmul.f32 0.001953125, %v649_v7  ;;  %v1471_v10 = vpop.f32.mrb[1].mxu1 }
 0x296   :  { %v652_v11 = vpop.f32.mrb[2].mxu1  ;;  %v1625_v10 = vld [vmem:[#allocation6 + $0x18] sm:$0xff]  }
 0x297   :  { %v656_v12 = vmul.f32 %v655_v9, %v655_v9  ;;  %v1472_v13 = vpop.f32.mrb[3].mxu1  ;;  %v1626_v11 = vld [vmem:[#allocation6 + $0x20] sm:$0xff]  }
 0x298   :  { %v1628_v13 = vld [vmem:[#allocation6 + $0x30] sm:$0xff]  }
 0x299   :  { %v658_v14 = vrot.slane %v656_v12, 7  ;;  %v1627_v12 = vld [vmem:[#allocation6 + $0x28] sm:$0xff]  }
 0x29b   :  { %v660_v15 = vsub.f32 %v655_v9, %v658_v14 }
 0x29d   :  { %v662_v16 = vadd.f32 1e-05, %v660_v15 }
 0x29f   :  { %1638 = vrsqrt.f32 %v662_v16  ;;  %v1629_v16 = vld [vmem:[#allocation6 + $0x38] sm:$0xff]  }
 0x2a9   :  { %v1639_v26 = vpop.eup %1638 }
 0x2aa   :  { %v671_v27 = vrot.slane %v1639_v26, %v1981_v24 }
 0x2ac   :  { %v672_v31 = vcombine.high %v671_v27, %v671_v27  ;;  %v1630_v27 = vld [vmem:[#allocation6 + $0x80] sm:$0xff]  }
 0x2ae   :  { %v679_v33 = vrot.slane %v672_v31, %v1981_v24 }
 0x2b0   :  { %v681_v35 = vmul.f32 %v679_v33, %v661_v32 }
 0x2b2   :  { %v683_v37 = vmul.f32 %v681_v35, %v655_v9  ;;  %v689_v40 = vrot.slane %v681_v35, %v1988_v34  ;;  %v1624_v9 = vld [vmem:[#allocation6 + $0x10] sm:$0xff]   ;;  %v1631_v35 = vld [vmem:[#allocation6 + $0x88] sm:$0xff]  }
 0x2b4   :  { %v684_v41 = vsub.f32 %v682_v36, %v683_v37  ;;  %v694_v42 = vmul.f32 %v689_v40, %v1968_v28  ;;  %v691_v44 = vmul.f32 %v689_v40, %v1960_v25  ;;  %v692_v45 = vmul.f32 %v689_v40, %v1964_v30  ;;  %v1632_v37 = vld [vmem:[#allocation6 + $0x90] sm:$0xff]  }
 0x2b5   :  { %v693_v46 = vmul.f32 %v689_v40, %v1962_v29 }
 0x2b6   :  { %v699_v43 = vrot.slane %v684_v41, %v1988_v34  ;;  %v1637_v41 = vld [vmem:[#allocation6 + $0xb8] sm:$0xff]  }
 0x2b8   :  { %v701_v50 = vadd.f32 %v699_v43, %v691_v44  ;;  %v702_v51 = vadd.f32 %v699_v43, %v692_v45  ;;  %v703_v52 = vadd.f32 %v699_v43, %v693_v46  ;;  %v704_v53 = vadd.f32 %v699_v43, %v694_v42 }
 0x2ba   :  { %vm706_vm3 = vcmp.gt.f32.partialorder %v701_v50, 0.0  ;;  %vm707_vm4 = vcmp.gt.f32.partialorder %v702_v51, 0.0  ;;  %v711_v54 = vmul.f32 %v710_v49, %v701_v50  ;;  %v712_v28 = vmul.f32 %v710_v49, %v702_v51 }
 0x2bb   :  { %vm708_vm5 = vcmp.gt.f32.partialorder %v703_v52, 0.0  ;;  %vm709_vm6 = vcmp.gt.f32.partialorder %v704_v53, 0.0  ;;  %v713_v55 = vmul.f32 %v710_v49, %v703_v52  ;;  %v714_v25 = vmul.f32 %v710_v49, %v704_v53  ;;  %v1314_v49 = vld [vmem:[%s2067_s4] ss:$0 sm:$0xff] }
 0x2bc   :  { %v715_v56 = vsel %vm706_vm3, %v701_v50, %v711_v54  ;;  %v716_v30 = vsel %vm707_vm4, %v702_v51, %v712_v28 }
 0x2bd   :  { %v724_v59 = vrot.slane %v716_v30, 7  ;;  %v757_v29 = vpack.c.bf16 %v716_v30, %v715_v56  ;;  %v2002_v60 = vsel %vm708_vm5, %v703_v52, %v713_v55  ;;  %v2004_v61 = vsel %vm709_vm6, %v704_v53, %v714_v25 }
 0x2be   :  { %v723_v62 = vrot.slane %v715_v56, 7  ;;  %v758_v63 = vpack.c.bf16 %v2004_v61, %v2002_v60  ;;  %v970_v14 = vrot.slane %v715_v56, 1  ;;  %v973_v15 = vrot.slane %v2002_v60, 1 }
 0x2bf   :  { %1489 = vmatprep.mubr.bf16.mxu1 %v757_v29  ;;  %v975_v40 = vrot.slane %v2004_v61, 1 }
 0x2c0   :  { %v725_v1 = vsel %vm107_vm0, %v723_v62, %v724_v59  ;;  %v734_v2 = vsel %vm107_vm0, %v715_v56, %v723_v62  ;;  %1490 = vmatmul.mubr.bf16.vlgmr.msra.gmra.mrb[4].mxu1 %v758_v63 }
 0x2c1   :  { %v735_v3 = vmul.f32 %v734_v2, %v1883_v39  ;;  %v736_v4 = vmul.f32 %v725_v1, %v1895_v48  ;;  %1494 = vmatpush3.bf16.msra.mxu1 %v1622_v5  ;;  %v726_v39 = vrot.slane %v2002_v60, 7  ;;  %v728_v48 = vrot.slane %v2004_v61, 7 }
 0x2c2   :  { %1495 = vmatprep.subr.bf16.mxu1 %v1623_v0  ;;  %v971_v5 = vrot.slane %v716_v30, 1  ;;  %v976_v42 = vsel %vm375_vm1, %v973_v15, %v975_v40  ;;  %v981_v43 = vsel %vm375_vm1, %v975_v40, %v2004_v61 }
 0x2c3   :  { %v739_v7 = vpack.c.bf16 %v736_v4, %v735_v3  ;;  %v727_v17 = vsel %vm107_vm0, %v724_v59, %v726_v39  ;;  %v729_v18 = vsel %vm107_vm0, %v726_v39, %v728_v48  ;;  %v984_v44 = vmul.f32 %v976_v42, %v1914_v8 }
 0x2c4   :  { %v972_v19 = vsel %vm375_vm1, %v970_v14, %v971_v5  ;;  %v974_v21 = vsel %vm375_vm1, %v971_v5, %v973_v15  ;;  %v737_v23 = vmul.f32 %v727_v17, %v1881_v38  ;;  %v738_v26 = vmul.f32 %v729_v18, %v1893_v47  ;;  %v1633_v38 = vld [vmem:[#allocation6 + $0x98] sm:$0xff]   ;;  %v1634_v47 = vld [vmem:[#allocation6 + $0xa0] sm:$0xff]  }
 0x2c5   :  { %1509 = vmatprep.mubr.bf16.mxu1 %v739_v7  ;;  %1496 = vmatpush3.bf16.msra.mxu1 %v1623_v0  ;;  %v982_v31 = vmul.f32 %v972_v19, %v1905_v58  ;;  %v983_v32 = vmul.f32 %v974_v21, %v1903_v57  ;;  %v1635_v58 = vld [vmem:[#allocation6 + $0xa8] sm:$0xff]   ;;  %v1636_v57 = vld [vmem:[#allocation6 + $0xb0] sm:$0xff]   ;;  %v985_v45 = vmul.f32 %v981_v43, %v1910_v6 }
 0x2c6   :  { %1497 = vmatprep.subr.bf16.mxu1 %v1624_v9  ;;  %v740_v33 = vpack.c.bf16 %v738_v26, %v737_v23 }
 0x2c7   :  { %v986_v36 = vpack.c.bf16 %v983_v32, %v982_v31  ;;  %v987_v46 = vpack.c.bf16 %v985_v45, %v984_v44 }
 0x2c9   :  { %1498 = vmatpush3.bf16.msra.mxu1 %v1624_v9 }
 0x2ca   :  { %1499 = vmatprep.subr.bf16.mxu1 %v1625_v10 }
 0x2cd   :  { %1500 = vmatpush3.bf16.msra.mxu1 %v1625_v10 }
 0x2ce   :  { %1501 = vmatprep.subr.bf16.mxu1 %v1626_v11 }
 0x2d1   :  { %1502 = vmatpush3.bf16.msra.mxu1 %v1626_v11 }
 0x2d2   :  { %1503 = vmatprep.subr.bf16.mxu1 %v1627_v12 }
 0x2d5   :  { %1504 = vmatpush3.bf16.msra.mxu1 %v1627_v12 }
 0x2d6   :  { %1505 = vmatprep.subr.bf16.mxu1 %v1628_v13 }
 0x2d9   :  { %1506 = vmatpush3.bf16.msra.mxu1 %v1628_v13 }
 0x2da   :  { %1507 = vmatprep.subr.bf16.mxu1 %v1629_v16 }
 0x2dd   :  { %1508 = vmatpush3.bf16.msra.mxu1 %v1629_v16 }
 0x2de   :  { %1513 = vmatprep.subr.bf16.mxu1 %v1630_v27 }
 0x2e0   :  { %1510 = vmatmul.mubr.bf16.vlgmr.msra.gmra.mrb[4].mxu1 %v740_v33  ;;  %v1187_v33 = vld [vmem:[%s2070_s7] sm:$0x1] }
 0x2e1   :  { %1514 = vmatpush3.bf16.msra.mxu1 %v1630_v27  ;;  %1529 = vmatprep.mubr.bf16.mxu1 %v986_v36 }
 0x2e2   :  { %1515 = vmatprep.subr.bf16.mxu1 %v1631_v35 }
 0x2e5   :  { %1516 = vmatpush3.bf16.msra.mxu1 %v1631_v35 }
 0x2e6   :  { %1517 = vmatprep.subr.bf16.mxu1 %v1632_v37 }
 0x2e9   :  { %1518 = vmatpush3.bf16.msra.mxu1 %v1632_v37  ;;  %v1208_v37 = vld [vmem:[%s2071_s8] sm:$0x1] }
 0x2ea   :  { %1519 = vmatprep.subr.bf16.mxu1 %v1633_v38 }
 0x2ed   :  { %1520 = vmatpush3.bf16.msra.mxu1 %v1633_v38 }
 0x2ee   :  { %1521 = vmatprep.subr.bf16.mxu1 %v1634_v47 }
 0x2f1   :  { %1522 = vmatpush3.bf16.msra.mxu1 %v1634_v47 }
 0x2f2   :  { %1523 = vmatprep.subr.bf16.mxu1 %v1635_v58 }
 0x2f5   :  { %1524 = vmatpush3.bf16.msra.mxu1 %v1635_v58 }
 0x2f6   :  { %1525 = vmatprep.subr.bf16.mxu1 %v1636_v57 }
 0x2f9   :  { %1526 = vmatpush3.bf16.msra.mxu1 %v1636_v57 }
 0x2fa   :  { %1527 = vmatprep.subr.bf16.mxu1 %v1637_v41 }
 0x2fd   :  { %1528 = vmatpush3.bf16.msra.mxu1 %v1637_v41 }
 0x300   :  { %1530 = vmatmul.mubr.bf16.vlgmr.msra.gmra.mrb[4].mxu1 %v987_v46 }
 0x3d3   :  { %v1531_v50 = vpop.f32.mrb[4].mxu1 }
 0x3d4   :  { %v1087_v51 = vpop.f32.mrb[5].mxu1  ;;  %v1115_v28 = vadd.f32 %v1531_v50, %v1314_v49 }
 0x3d5   :  { %v1113_v52 = vadd.f32 %v1314_v49, %v1087_v51  ;;  %v1532_v53 = vpop.f32.mrb[6].mxu1  ;;  %v1643_v51 = vld [vmem:[%s2063_s0 + $0x8] sm:$0xff] }
 0x3d6   :  { %v1090_v54 = vpop.f32.mrb[7].mxu1  ;;  %v1116_v56 = vadd.f32 %v1532_v53, %v1314_v49  ;;  %v1128_v59 = vmul.f32 %v1115_v28, %v1115_v28 }
 0x3d7   :  { %v1114_v55 = vadd.f32 %v1314_v49, %v1090_v54  ;;  %v1126_v25 = vmul.f32 %v1113_v52, %v1113_v52  ;;  %v1642_v49 = vld [vmem:[%s2063_s0] sm:$0xff] }
 0x3d8   :  { %v1129_v60 = vmul.f32 %v1116_v56, %v1116_v56 }
 0x3d9   :  { %v1117_v30 = vadd.f32 %v1114_v55, %v1113_v52  ;;  %v1127_v8 = vmul.f32 %v1114_v55, %v1114_v55 }
 0x3db   :  { %v1118_v6 = vadd.f32 %v1117_v30, %v1115_v28  ;;  %v1130_v29 = vadd.f32 %v1127_v8, %v1126_v25 }
 0x3dd   :  { %v1119_v61 = vadd.f32 %v1118_v6, %v1116_v56  ;;  %v1131_v62 = vadd.f32 %v1130_v29, %v1128_v59 }
 0x3df   :  { %v1120_v63 = vrot.slane %v1119_v61, 4  ;;  %v1132_v0 = vadd.f32 %v1131_v62, %v1129_v60 }
 0x3e1   :  { %v1121_v1 = vadd.f32 %v1120_v63, %v1119_v61  ;;  %v1133_v2 = vrot.slane %v1132_v0, 4 }
 0x3e3   :  { %v1122_v3 = vrot.slane %v1121_v1, 2  ;;  %v1134_v4 = vadd.f32 %v1133_v2, %v1132_v0 }
 0x3e5   :  { %v1123_v7 = vadd.f32 %v1122_v3, %v1121_v1  ;;  %v1135_v9 = vrot.slane %v1134_v4, 2 }
 0x3e7   :  { %v1124_v10 = vrot.slane %v1123_v7, 1  ;;  %v1136_v11 = vadd.f32 %v1135_v9, %v1134_v4 }
 0x3e9   :  { %v1137_v12 = vrot.slane %v1136_v11, 1  ;;  %v1125_v13 = vadd.f32 %v1124_v10, %v1123_v7 }
 0x3eb   :  { %v1138_v39 = vadd.f32 %v1137_v12, %v1136_v11 }
 0x3ed   :  { %v1139_v48 = vsel %vm107_vm0, %v1125_v13, %v1138_v39 }
 0x3ee   :  { %v1140_v5 = vpack.c.bf16 %v1139_v48, %v1139_v48 }
 0x3f0   :  { %1550 = vmatmul.mubr.bf16.vlgmr.msra.gmra.mrb[4].mxu0 %v1140_v5 }
 0x4c3   :  { %v1175_v14 = vpop.f32.mrb[4].mxu0 }
 0x4c4   :  { %v1181_v15 = vmul.f32 0.001953125, %v1175_v14  ;;  %v1551_v16 = vpop.f32.mrb[5].mxu0 }
 0x4c5   :  { %v1178_v17 = vpop.f32.mrb[6].mxu0 }
 0x4c6   :  { %v1182_v18 = vmul.f32 %v1181_v15, %v1181_v15  ;;  %v1552_v19 = vpop.f32.mrb[7].mxu0 }
 0x4c8   :  { %v1184_v21 = vrot.slane %v1182_v18, 7 }
 0x4ca   :  { %v1186_v23 = vsub.f32 %v1181_v15, %v1184_v21 }
 0x4cc   :  { %v1188_v26 = vadd.f32 1e-05, %v1186_v23 }
 0x4ce   :  { %1640 = vrsqrt.f32 %v1188_v26 }
 0x4d8   :  { %v1641_v27 = vpop.eup %1640 }
 0x4d9   :  { %v1197_v31 = vrot.slane %v1641_v27, %v1981_v24 }
 0x4db   :  { %v1198_v32 = vcombine.high %v1197_v31, %v1197_v31 }
 0x4dd   :  { %v1205_v35 = vrot.slane %v1198_v32, %v1981_v24 }
 0x4df   :  { %v1207_v36 = vmul.f32 %v1205_v35, %v1187_v33 }
 0x4e1   :  { %v1209_v38 = vmul.f32 %v1207_v36, %v1181_v15  ;;  %v1215_v47 = vrot.slane %v1207_v36, %v1988_v34 }
 0x4e3   :  { %v1210_v58 = vsub.f32 %v1208_v37, %v1209_v38  ;;  %v1217_v57 = vmul.f32 %v1215_v47, %v1113_v52  ;;  %v1218_v40 = vmul.f32 %v1215_v47, %v1114_v55  ;;  %v1219_v41 = vmul.f32 %v1215_v47, %v1115_v28 }
 0x4e4   :  { %v1220_v42 = vmul.f32 %v1215_v47, %v1116_v56 }
 0x4e5   :  { %v1225_v43 = vrot.slane %v1210_v58, %v1988_v34 }
 0x4e7   :  { %v1227_v44 = vadd.f32 %v1225_v43, %v1217_v57  ;;  %v1228_v45 = vadd.f32 %v1225_v43, %v1218_v40  ;;  %v1229_v24 = vadd.f32 %v1225_v43, %v1219_v41  ;;  %v1230_v46 = vadd.f32 %v1225_v43, %v1220_v42 }
 0x4e9   :  { %v1231_v50 = vadd.f32 %v1642_v49, %v1227_v44  ;;  %v1232_v52 = vadd.f32 %v1643_v51, %v1228_v45  ;;  %v1233_v53 = vadd.f32 %v1229_v24, %v1860_v20  ;;  %v1234_v34 = vadd.f32 %v1230_v46, %v1865_v22 }
 0x4eb   :  { %1235 = vst [vmem:[#allocation8] sm:$0xff] %v1231_v50  ;;  %1236 = vst [vmem:[#allocation8 + $0x8] sm:$0xff] %v1232_v52 }
 0x4ec   :  { %1237 = vst [vmem:[#allocation8 + $0x10] sm:$0xff] %v1233_v53  ;;  %1238 = vst [vmem:[#allocation8 + $0x18] sm:$0xff] %v1234_v34 }
 0x4ed   :  { %1699 = shalt.err (!%p1696_p6)
}
 0x4ee   :  { %s1700_s0 = scalar_lea.hbm %s2076_s13, 512 }
 0x4ef   :  { %p1701_p7 = scmp.ne.s32.totalorder %s2076_s13, %s1700_s0  ;;  %p1704_p8 = scmp.lt.u32.totalorder %s1700_s0, %s2076_s13 }
 0x4f1   :  { %p1706_p9 = pnand %p1704_p8, %p1701_p7 }
 0x4f3   :  { %1709 = shalt.err (!%p1706_p9)
}
 0x4f4   :  { %s1725_s15 = smov 128   ;;  %s1726_s1 = smov 8  }
 0x4f5   :  { %1250 = dma.vmem_to_hbm [thread:$0]  %s1245_s18, 512, %s2076_s13, [#allocation5], %s1725_s15, %s1725_s15, %s1726_s1  }
 0x4f6   :  { %1714 = dma.done.wait [#allocation5], 512  }
 0x4f7   :  { %1715 = vsyncadd [#allocation5], 4294966784 }
 0x4f8   :  { %1254 = vsyncpa [#allocation4], 1 }
 0x4f9   :  { %1255 = vsyncpa [#allocation7], 1 }
 0x4fa   :  { %1256 = vsyncpa [#allocation5], 1 }

</bundles_post_ra>
